<compile_context>
chip_gen: v7x
topology: tpu7x:2x2x1
jax: 0.10.0
libtpu: 0.0.40
codegen_flags: <defaults>
</compile_context>

<pallas_src>
import functools

import numpy as np
import jax
import jax.numpy as jnp
from jax.experimental import pallas as pl
from jax.experimental.pallas import tpu as pltpu

HIDDEN = 64
DIST_RANGE = 5.0


def _round_up(n, m):
    return ((n + m - 1) // m) * m


def _v2p_kernel(x_ref, wfuse_ref, bfuse_ref,
                wconv_ref, bconv_ref,
                wtune_ref, btune_ref,
                wo1_ref, bo1_ref,
                wo2_ref, bo2_ref,
                out_ref, fuse_scr,
                *, k, pre_channels, out_channels, kc_pad):
    f32 = jnp.float32
    cdt = wfuse_ref.dtype                   # MXU operand dtype (bf16 by default)
    H = HIDDEN
    kH = k * H
    kC = x_ref.shape[1]
    T = x_ref.shape[0]

    xt = x_ref[...].astype(f32)             # (T, k*C) batch-major tile
    # d_weight: clip(1 - offset / dist_range, min=0), applied to the whole
    # tile; non-offset columns hit zero weight rows so they don't contribute.
    xc = jnp.maximum(1.0 - xt / DIST_RANGE, 0.0)

    # Stage [xt | xc] into a lane-tile-aligned VMEM scratch so both projection
    # matmuls fuse into a single 2*kc_pad-deep dot (fills the 256-deep
    # v6e/v7x MXU; neutral on v5e).  Pad lanes are zeroed every iteration so
    # stale VMEM can never inject NaN into the (value * 0-weight) products.
    fuse_scr[:, :kC] = xt
    fuse_scr[:, kc_pad:kc_pad + kC] = xc
    if kc_pad > kC:                         # static (trace-time) condition
        zpad = jnp.zeros((T, kc_pad - kC), f32)
        fuse_scr[:, kC:kc_pad] = zpad
        fuse_scr[:, kc_pad + kC:] = zpad

    # Fused per-neighbour projections:
    #   cols [j*64 : (j+1)*64]          = feature_j @ w_in + b_in   (-> ReLU)
    #   cols [kH + j*64 : kH+(j+1)*64]  = offw_j    @ w_off + b_off (-> tanh)
    pre_act = (jnp.dot(fuse_scr[...].astype(cdt), wfuse_ref[...],
                       preferred_element_type=f32)
               + bfuse_ref[...])            # (T, 2*k*64)

    a = jnp.maximum(pre_act[:, :kH], 0.0)   # == tmp_in, flattened (T, k*64)
    t = jnp.tanh(pre_act[:, kH:])           # == offset_w, flattened (T, k*64)
    m = a * t                               # col j*64+c == m[b, j, c]

    # Conv1d(64, 64, k) on the PyTorch .view(-1, 64, k): input length == kernel
    # size, so it's one dense contraction over the flattened k*64 axis.
    conv = jnp.maximum(
        jnp.dot(m.astype(cdt), wconv_ref[...], preferred_element_type=f32)
        + bconv_ref[...], 0.0)              # (T, 64)

    # Linear(64, 64) + tmp_in[:, 0, :]   (cols 0:64 of `a` are neighbour j=0)
    tune = (jnp.dot(conv.astype(cdt), wtune_ref[...], preferred_element_type=f32)
            + btune_ref[...] + a[:, :H])

    # Linear(64,64) + ReLU + Linear(64, out)  (dot kept lane-dense internally)
    h = jnp.maximum(
        jnp.dot(tune.astype(cdt), wo1_ref[...], preferred_element_type=f32)
        + bo1_ref[...], 0.0)
    out_full = (jnp.dot(h.astype(cdt), wo2_ref[...], preferred_element_type=f32)
                + bo2_ref[...])             # (T, o_pad)

    # Residual "+ pre[:, 0, :]": exact f32 VPU add (x columns [0:pre] of
    # neighbour j=0), then a narrow out_channels-wide store.
    out = out_full[:, :out_channels] + xt[:, :pre_channels]
    out_ref[...] = out.astype(out_ref.dtype)


def v2p_finetuner_v3(x, d, params, *, pre_channels, f_channels, out_channels, k,
                     tile_b=2048, compute_dtype=jnp.bfloat16,
                     vmem_limit_bytes=48 * 1024 * 1024):
    """Pallas implementation of V2PFinetuner_v3.forward(x, d).
    `d` is unused (exactly as in the PyTorch forward).  `x` may be f32 or bf16."""
    del d
    B, K, C = x.shape
    assert K == k, f"x neighbour dim {K} != k {k}"
    assert C == pre_channels + f_channels + 3, "channel split mismatch"
    assert out_channels == pre_channels, (
        "residual `+ pre[:, 0, :]` requires out_channels == pre_channels")

    H = HIDDEN
    kH = k * H
    kC = k * C
    kc_pad = _round_up(kC, 128)             # lane-tile-aligned half-width
    o_pad = _round_up(out_channels, 128)    # internal width of the final dot

    # ---- pack weights (tiny, one-off; all stored input-major (in, out)) ----
    # Fused projection weight: rows [0, kC) act on raw x, rows [kc_pad, kc_pad+kC)
    # act on the clipped x; remaining rows are zero (match the zeroed pad lanes).
    wfuse = jnp.zeros((2 * kc_pad, 2 * kH), jnp.float32)
    for j in range(k):
        wfuse = wfuse.at[j * C + pre_channels: j * C + pre_channels + f_channels,
                         j * H:(j + 1) * H].set(params["w_in"])
        wfuse = wfuse.at[kc_pad + j * C + pre_channels + f_channels:
                         kc_pad + (j + 1) * C,
                         kH + j * H: kH + (j + 1) * H].set(params["w_off"])
    bfuse = jnp.concatenate(
        [jnp.tile(params["b_in"].reshape(1, H), (1, k)),
         jnp.tile(params["b_off"].reshape(1, H), (1, k))], axis=1)  # (1, 2*k*64)

    # Conv1d weight (64, 64, k) -> dense contraction matrix over the flattened
    # 64*k axis of the .view(-1, 64, k) input (flat index j*64+c == ci*k+t).
    wconv = params["w_conv"].reshape(H, H * k).T                    # (k*64, 64)

    wo2 = jnp.zeros((H, o_pad), jnp.float32).at[:, :out_channels].set(params["w_o2"])
    bo2 = jnp.zeros((1, o_pad), jnp.float32).at[:, :out_channels].set(params["b_o2"])

    cdt = compute_dtype
    weights = (
        wfuse.astype(cdt), bfuse.astype(jnp.float32),
        wconv.astype(cdt), params["b_conv"].reshape(1, H).astype(jnp.float32),
        params["w_tune"].astype(cdt), params["b_tune"].reshape(1, H).astype(jnp.float32),
        params["w_o1"].astype(cdt), params["b_o1"].reshape(1, H).astype(jnp.float32),
        wo2.astype(cdt), bo2.astype(jnp.float32),
    )

    # ---- batch tiling: free batch-major reshape, NO transpose, NO jnp.pad ----
    # The grid may be ragged: the last block computes on garbage rows.  That is
    # safe because every row is fully independent (never add a cross-row
    # reduction here) and Pallas drops the out-of-bounds output stores.
    x2 = x.reshape(B, kC)
    n_tiles = max(1, pl.cdiv(B, tile_b))
    if n_tiles < 2 and B >= 32:
        n_tiles = 2                          # let v7x megacore split the grid
    tb = _round_up(pl.cdiv(B, n_tiles), 16)  # sublane-aligned tile rows
    grid = (pl.cdiv(B, tb),)

    x_spec = pl.BlockSpec((tb, kC), lambda i: (i, 0))
    # Constant index_maps -> weights DMA'd once, VMEM-resident across the grid.
    w_specs = [pl.BlockSpec(w.shape, lambda i: (0, 0)) for w in weights]
    out_spec = pl.BlockSpec((tb, out_channels), lambda i: (i, 0))

    kernel = functools.partial(_v2p_kernel, k=k, pre_channels=pre_channels,
                               out_channels=out_channels, kc_pad=kc_pad)

    w_bytes = sum(int(np.prod(w.shape)) * w.dtype.itemsize for w in weights)
    cost = pl.CostEstimate(
        flops=2 * B * (2 * kc_pad * 2 * kH + kH * H + H * H + H * H + H * o_pad),
        transcendentals=B * kH,
        bytes_accessed=B * kC * x.dtype.itemsize + B * out_channels * 4 + w_bytes,
    )

    out = pl.pallas_call(
        kernel,
        out_shape=jax.ShapeDtypeStruct((B, out_channels), jnp.float32),
        grid=grid,
        in_specs=[x_spec] + w_specs,
        out_specs=out_spec,
        scratch_shapes=[pltpu.VMEM((tb, 2 * kc_pad), jnp.float32)],
        compiler_params=pltpu.CompilerParams(
            dimension_semantics=("parallel",),        # megacore sharding on v7x
            vmem_limit_bytes=vmem_limit_bytes),
        cost_estimate=cost,
    )(x2, *weights)

    return out


def init_params(key, f_channels, out_channels, k):
    ks = jax.random.split(key, 12)
    n = lambda kk, shape, s=0.1: (s * jax.random.normal(kk, shape)).astype(jnp.float32)
    return {
        # Linear weights stored as (in_features, out_features).
        "w_in":   n(ks[0], (f_channels, HIDDEN)),
        "b_in":   n(ks[1], (1, HIDDEN)),
        "w_off":  n(ks[2], (3, HIDDEN)),
        "b_off":  n(ks[3], (1, HIDDEN)),
        "w_conv": n(ks[4], (HIDDEN, HIDDEN, k)),       # PyTorch Conv1d layout
        "b_conv": n(ks[5], (1, HIDDEN)),
        "w_tune": n(ks[6], (HIDDEN, HIDDEN)),
        "b_tune": n(ks[7], (1, HIDDEN)),
        "w_o1":   n(ks[8], (HIDDEN, HIDDEN)),
        "b_o1":   n(ks[9], (1, HIDDEN)),
        "w_o2":   n(ks[10], (HIDDEN, out_channels)),
        "b_o2":   n(ks[11], (1, out_channels)),
    }


def ref_forward(x, params, pre_channels, f_channels, k):
    """Pure-JAX (f32) transcription of the PyTorch forward, for verification."""
    pre = x[:, :, :pre_channels]
    feature = x[:, :, pre_channels:pre_channels + f_channels]
    offset = x[:, :, pre_channels + f_channels:]
    offw = jnp.clip(1.0 - offset / DIST_RANGE, 0.0)
    tmp_in = jax.nn.relu(feature @ params["w_in"] + params["b_in"])      # (B,k,64)
    ow = jnp.tanh(offw @ params["w_off"] + params["b_off"])              # (B,k,64)
    m = (tmp_in * ow).reshape(-1, HIDDEN, k)                             # .view(-1,64,k)
    conv = jax.nn.relu(
        jnp.einsum("oct,bct->bo", params["w_conv"], m) + params["b_conv"])
    tune = conv @ params["w_tune"] + params["b_tune"] + tmp_in[:, 0, :]
    h = jax.nn.relu(tune @ params["w_o1"] + params["b_o1"])
    return h @ params["w_o2"] + params["b_o2"] + pre[:, 0, :]


if __name__ == "__main__":
    pre_channels, f_channels, out_channels, k = 8, 16, 8, 4  # out must == pre (residual)
    C = pre_channels + f_channels + 3

    key = jax.random.PRNGKey(0)
    kx1, kx2, kd, kp = jax.random.split(key, 4)
    params = init_params(kp, f_channels, out_channels, k)

    # Small case (B=2: single ragged tile) and a multi-tile ragged case (B=50:
    # two tiles of 32 rows, second one partial) exercising the grid/clip path.
    for B, kxi in ((2, kx1), (50, kx2)):
        x = jax.random.normal(kxi, (B, k, C), jnp.float32)
        d = jax.random.normal(kd, (B,), jnp.float32)   # unused by forward (as in PyTorch)

        out = v2p_finetuner_v3(x, d, params, pre_channels=pre_channels,
                               f_channels=f_channels, out_channels=out_channels,
                               k=k)
        out = jax.block_until_ready(out)

        ref = ref_forward(x, params, pre_channels, f_channels, k)
        # bf16 MXU operands with f32 accumulation -> relaxed tolerance; the
        # residual adds (pre0, tmp_in[:,0,:]) stay exact f32.
        np.testing.assert_allclose(np.asarray(out), np.asarray(ref),
                                   rtol=2e-2, atol=2e-2)

    print("KERNEL_OK")
</pallas_src>

<mosaic_0001>
module attributes {stable_mosaic.version = 11 : i64} {
  func.func @_v2p_kernel(%arg0: i32, %arg1: memref<16x108xf32, #tpu.memory_space<vmem>>, %arg2: memref<256x512xbf16, #tpu.memory_space<vmem>>, %arg3: memref<1x512xf32, #tpu.memory_space<vmem>>, %arg4: memref<256x64xbf16, #tpu.memory_space<vmem>>, %arg5: memref<1x64xf32, #tpu.memory_space<vmem>>, %arg6: memref<64x64xbf16, #tpu.memory_space<vmem>>, %arg7: memref<1x64xf32, #tpu.memory_space<vmem>>, %arg8: memref<64x64xbf16, #tpu.memory_space<vmem>>, %arg9: memref<1x64xf32, #tpu.memory_space<vmem>>, %arg10: memref<64x128xbf16, #tpu.memory_space<vmem>>, %arg11: memref<1x128xf32, #tpu.memory_space<vmem>>, %arg12: memref<16x8xf32, #tpu.memory_space<vmem>>, %arg13: memref<16x256xf32, #tpu.memory_space<vmem>>) attributes {dimension_semantics = [#tpu.dimension_semantics<parallel>], iteration_bounds = array<i64: 1>, scalar_prefetch = 0 : i64, scratch_operands = 1 : i64, tpu.core_type = #tpu.core_type<tc>, window_params = [{transform_indices = @transform_0, window_bounds = array<i64: 16, 108>}, {pipeline_mode = #tpu.pipeline_mode<synchronous>, transform_indices = @transform_1, window_bounds = array<i64: 256, 512>}, {pipeline_mode = #tpu.pipeline_mode<synchronous>, transform_indices = @transform_2, window_bounds = array<i64: 1, 512>}, {pipeline_mode = #tpu.pipeline_mode<synchronous>, transform_indices = @transform_3, window_bounds = array<i64: 256, 64>}, {pipeline_mode = #tpu.pipeline_mode<synchronous>, transform_indices = @transform_4, window_bounds = array<i64: 1, 64>}, {pipeline_mode = #tpu.pipeline_mode<synchronous>, transform_indices = @transform_5, window_bounds = array<i64: 64, 64>}, {pipeline_mode = #tpu.pipeline_mode<synchronous>, transform_indices = @transform_6, window_bounds = array<i64: 1, 64>}, {pipeline_mode = #tpu.pipeline_mode<synchronous>, transform_indices = @transform_7, window_bounds = array<i64: 64, 64>}, {pipeline_mode = #tpu.pipeline_mode<synchronous>, transform_indices = @transform_8, window_bounds = array<i64: 1, 64>}, {pipeline_mode = #tpu.pipeline_mode<synchronous>, transform_indices = @transform_9, window_bounds = array<i64: 64, 128>}, {pipeline_mode = #tpu.pipeline_mode<synchronous>, transform_indices = @transform_10, window_bounds = array<i64: 1, 128>}, {transform_indices = @transform_11, window_bounds = array<i64: 16, 8>}]} {
    %c0 = arith.constant 0 : index
    %c0_0 = arith.constant 0 : index
    %0 = vector.load %arg1[%c0, %c0_0] : memref<16x108xf32, #tpu.memory_space<vmem>>, vector<16x108xf32>
    %cst = arith.constant 5.000000e+00 : f32
    %1 = vector.broadcast %cst : f32 to vector<16x108xf32>
    %2 = arith.divf %0, %1 : vector<16x108xf32>
    %cst_1 = arith.constant 1.000000e+00 : f32
    %3 = vector.broadcast %cst_1 : f32 to vector<16x108xf32>
    %4 = arith.subf %3, %2 : vector<16x108xf32>
    %cst_2 = arith.constant 0.000000e+00 : f32
    %5 = vector.broadcast %cst_2 : f32 to vector<16x108xf32>
    %6 = arith.maximumf %4, %5 : vector<16x108xf32>
    %c0_3 = arith.constant 0 : index
    %c0_4 = arith.constant 0 : index
    %7 = vector.load %arg13[%c0_3, %c0_4] : memref<16x256xf32, #tpu.memory_space<vmem>>, vector<16x108xf32>
    tpu.vector_store %arg13[%c0_3, %c0_4], %0 {strides = array<i32>} : memref<16x256xf32, #tpu.memory_space<vmem>>, vector<16x108xf32>,
    %c0_5 = arith.constant 0 : index
    %c128 = arith.constant 128 : index
    %8 = vector.load %arg13[%c0_5, %c128] : memref<16x256xf32, #tpu.memory_space<vmem>>, vector<16x108xf32>
    tpu.vector_store %arg13[%c0_5, %c128], %6 {strides = array<i32>} : memref<16x256xf32, #tpu.memory_space<vmem>>, vector<16x108xf32>,
    %cst_6 = arith.constant 0.000000e+00 : f32
    %9 = vector.broadcast %cst_6 : f32 to vector<16x20xf32>
    %c0_7 = arith.constant 0 : index
    %c108 = arith.constant 108 : index
    %10 = vector.load %arg13[%c0_7, %c108] : memref<16x256xf32, #tpu.memory_space<vmem>>, vector<16x20xf32>
    tpu.vector_store %arg13[%c0_7, %c108], %9 {strides = array<i32>} : memref<16x256xf32, #tpu.memory_space<vmem>>, vector<16x20xf32>,
    %c0_8 = arith.constant 0 : index
    %c236 = arith.constant 236 : index
    %11 = vector.load %arg13[%c0_8, %c236] : memref<16x256xf32, #tpu.memory_space<vmem>>, vector<16x20xf32>
    tpu.vector_store %arg13[%c0_8, %c236], %9 {strides = array<i32>} : memref<16x256xf32, #tpu.memory_space<vmem>>, vector<16x20xf32>,
    %c0_9 = arith.constant 0 : index
    %c0_10 = arith.constant 0 : index
    %12 = vector.load %arg13[%c0_9, %c0_10] : memref<16x256xf32, #tpu.memory_space<vmem>>, vector<16x256xf32>
    %13 = arith.truncf %12 : vector<16x256xf32> to vector<16x256xbf16>
    %c0_11 = arith.constant 0 : index
    %c0_12 = arith.constant 0 : index
    %14 = vector.load %arg2[%c0_11, %c0_12] : memref<256x512xbf16, #tpu.memory_space<vmem>>, vector<256x512xbf16>
    %cst_13 = arith.constant dense<0.000000e+00> : vector<16x512xf32>
    %15 = tpu.matmul %13, %14, %cst_13 {dimension_numbers = #tpu.dot_dimension_numbers<[1], [0], [0], [1], [0, 0, 1, 1], [], []>} : vector<16x256xbf16>, vector<256x512xbf16>, vector<16x512xf32> -> vector<16x512xf32>
    %c0_14 = arith.constant 0 : index
    %c0_15 = arith.constant 0 : index
    %16 = vector.load %arg3[%c0_14, %c0_15] : memref<1x512xf32, #tpu.memory_space<vmem>>, vector<1x512xf32>
    %17 = vector.broadcast %16 : vector<1x512xf32> to vector<16x512xf32>
    %18 = arith.addf %15, %17 : vector<16x512xf32>
    %19 = vector.extract_strided_slice %18 {offsets = [0, 0], sizes = [16, 256], strides = [1, 1]} : vector<16x512xf32> to vector<16x256xf32>
    %cst_16 = arith.constant 0.000000e+00 : f32
    %20 = vector.broadcast %cst_16 : f32 to vector<16x256xf32>
    %21 = arith.maximumf %19, %20 : vector<16x256xf32>
    %22 = vector.extract_strided_slice %18 {offsets = [0, 256], sizes = [16, 256], strides = [1, 1]} : vector<16x512xf32> to vector<16x256xf32>
    %23 = math.tanh %22 : vector<16x256xf32>
    %24 = arith.mulf %21, %23 : vector<16x256xf32>
    %25 = arith.truncf %24 : vector<16x256xf32> to vector<16x256xbf16>
    %c0_17 = arith.constant 0 : index
    %c0_18 = arith.constant 0 : index
    %26 = vector.load %arg4[%c0_17, %c0_18] : memref<256x64xbf16, #tpu.memory_space<vmem>>, vector<256x64xbf16>
    %cst_19 = arith.constant dense<0.000000e+00> : vector<16x64xf32>
    %27 = tpu.matmul %25, %26, %cst_19 {dimension_numbers = #tpu.dot_dimension_numbers<[1], [0], [0], [1], [0, 0, 1, 1], [], []>} : vector<16x256xbf16>, vector<256x64xbf16>, vector<16x64xf32> -> vector<16x64xf32>
    %c0_20 = arith.constant 0 : index
    %c0_21 = arith.constant 0 : index
    %28 = vector.load %arg5[%c0_20, %c0_21] : memref<1x64xf32, #tpu.memory_space<vmem>>, vector<1x64xf32>
    %29 = vector.broadcast %28 : vector<1x64xf32> to vector<16x64xf32>
    %30 = arith.addf %27, %29 : vector<16x64xf32>
    %cst_22 = arith.constant 0.000000e+00 : f32
    %31 = vector.broadcast %cst_22 : f32 to vector<16x64xf32>
    %32 = arith.maximumf %30, %31 : vector<16x64xf32>
    %33 = arith.truncf %32 : vector<16x64xf32> to vector<16x64xbf16>
    %c0_23 = arith.constant 0 : index
    %c0_24 = arith.constant 0 : index
    %34 = vector.load %arg6[%c0_23, %c0_24] : memref<64x64xbf16, #tpu.memory_space<vmem>>, vector<64x64xbf16>
    %cst_25 = arith.constant dense<0.000000e+00> : vector<16x64xf32>
    %35 = tpu.matmul %33, %34, %cst_25 {dimension_numbers = #tpu.dot_dimension_numbers<[1], [0], [0], [1], [0, 0, 1, 1], [], []>} : vector<16x64xbf16>, vector<64x64xbf16>, vector<16x64xf32> -> vector<16x64xf32>
    %c0_26 = arith.constant 0 : index
    %c0_27 = arith.constant 0 : index
    %36 = vector.load %arg7[%c0_26, %c0_27] : memref<1x64xf32, #tpu.memory_space<vmem>>, vector<1x64xf32>
    %37 = vector.broadcast %36 : vector<1x64xf32> to vector<16x64xf32>
    %38 = arith.addf %35, %37 : vector<16x64xf32>
    %39 = vector.extract_strided_slice %21 {offsets = [0, 0], sizes = [16, 64], strides = [1, 1]} : vector<16x256xf32> to vector<16x64xf32>
    %40 = arith.addf %38, %39 : vector<16x64xf32>
    %41 = arith.truncf %40 : vector<16x64xf32> to vector<16x64xbf16>
    %c0_28 = arith.constant 0 : index
    %c0_29 = arith.constant 0 : index
    %42 = vector.load %arg8[%c0_28, %c0_29] : memref<64x64xbf16, #tpu.memory_space<vmem>>, vector<64x64xbf16>
    %cst_30 = arith.constant dense<0.000000e+00> : vector<16x64xf32>
    %43 = tpu.matmul %41, %42, %cst_30 {dimension_numbers = #tpu.dot_dimension_numbers<[1], [0], [0], [1], [0, 0, 1, 1], [], []>} : vector<16x64xbf16>, vector<64x64xbf16>, vector<16x64xf32> -> vector<16x64xf32>
    %c0_31 = arith.constant 0 : index
    %c0_32 = arith.constant 0 : index
    %44 = vector.load %arg9[%c0_31, %c0_32] : memref<1x64xf32, #tpu.memory_space<vmem>>, vector<1x64xf32>
    %45 = vector.broadcast %44 : vector<1x64xf32> to vector<16x64xf32>
    %46 = arith.addf %43, %45 : vector<16x64xf32>
    %cst_33 = arith.constant 0.000000e+00 : f32
    %47 = vector.broadcast %cst_33 : f32 to vector<16x64xf32>
    %48 = arith.maximumf %46, %47 : vector<16x64xf32>
    %49 = arith.truncf %48 : vector<16x64xf32> to vector<16x64xbf16>
    %c0_34 = arith.constant 0 : index
    %c0_35 = arith.constant 0 : index
    %50 = vector.load %arg10[%c0_34, %c0_35] : memref<64x128xbf16, #tpu.memory_space<vmem>>, vector<64x128xbf16>
    %cst_36 = arith.constant dense<0.000000e+00> : vector<16x128xf32>
    %51 = tpu.matmul %49, %50, %cst_36 {dimension_numbers = #tpu.dot_dimension_numbers<[1], [0], [0], [1], [0, 0, 1, 1], [], []>} : vector<16x64xbf16>, vector<64x128xbf16>, vector<16x128xf32> -> vector<16x128xf32>
    %c0_37 = arith.constant 0 : index
    %c0_38 = arith.constant 0 : index
    %52 = vector.load %arg11[%c0_37, %c0_38] : memref<1x128xf32, #tpu.memory_space<vmem>>, vector<1x128xf32>
    %53 = vector.broadcast %52 : vector<1x128xf32> to vector<16x128xf32>
    %54 = arith.addf %51, %53 : vector<16x128xf32>
    %55 = vector.extract_strided_slice %54 {offsets = [0, 0], sizes = [16, 8], strides = [1, 1]} : vector<16x128xf32> to vector<16x8xf32>
    %56 = vector.extract_strided_slice %0 {offsets = [0, 0], sizes = [16, 8], strides = [1, 1]} : vector<16x108xf32> to vector<16x8xf32>
    %57 = arith.addf %55, %56 : vector<16x8xf32>
    %c0_39 = arith.constant 0 : index
    %c0_40 = arith.constant 0 : index
    %58 = vector.load %arg12[%c0_39, %c0_40] : memref<16x8xf32, #tpu.memory_space<vmem>>, vector<16x8xf32>
    tpu.vector_store %arg12[%c0_39, %c0_40], %57 {strides = array<i32>} : memref<16x8xf32, #tpu.memory_space<vmem>>, vector<16x8xf32>,
    return
  }
  func.func @transform_0(%arg0: i32) -> (i32, i32) {
    %c0_i32 = arith.constant 0 : i32
    %c0_i32_0 = arith.constant 0 : i32
    return %arg0, %c0_i32 : i32, i32
  }
  func.func @transform_1(%arg0: i32) -> (i32, i32) {
    %c0_i32 = arith.constant 0 : i32
    %c0_i32_0 = arith.constant 0 : i32
    %c0_i32_1 = arith.constant 0 : i32
    return %c0_i32, %c0_i32_0 : i32, i32
  }
  func.func @transform_2(%arg0: i32) -> (i32, i32) {
    %c0_i32 = arith.constant 0 : i32
    %c0_i32_0 = arith.constant 0 : i32
    %c0_i32_1 = arith.constant 0 : i32
    return %c0_i32, %c0_i32_0 : i32, i32
  }
  func.func @transform_3(%arg0: i32) -> (i32, i32) {
    %c0_i32 = arith.constant 0 : i32
    %c0_i32_0 = arith.constant 0 : i32
    %c0_i32_1 = arith.constant 0 : i32
    return %c0_i32, %c0_i32_0 : i32, i32
  }
  func.func @transform_4(%arg0: i32) -> (i32, i32) {
    %c0_i32 = arith.constant 0 : i32
    %c0_i32_0 = arith.constant 0 : i32
    %c0_i32_1 = arith.constant 0 : i32
    return %c0_i32, %c0_i32_0 : i32, i32
  }
  func.func @transform_5(%arg0: i32) -> (i32, i32) {
    %c0_i32 = arith.constant 0 : i32
    %c0_i32_0 = arith.constant 0 : i32
    %c0_i32_1 = arith.constant 0 : i32
    return %c0_i32, %c0_i32_0 : i32, i32
  }
  func.func @transform_6(%arg0: i32) -> (i32, i32) {
    %c0_i32 = arith.constant 0 : i32
    %c0_i32_0 = arith.constant 0 : i32
    %c0_i32_1 = arith.constant 0 : i32
    return %c0_i32, %c0_i32_0 : i32, i32
  }
  func.func @transform_7(%arg0: i32) -> (i32, i32) {
    %c0_i32 = arith.constant 0 : i32
    %c0_i32_0 = arith.constant 0 : i32
    %c0_i32_1 = arith.constant 0 : i32
    return %c0_i32, %c0_i32_0 : i32, i32
  }
  func.func @transform_8(%arg0: i32) -> (i32, i32) {
    %c0_i32 = arith.constant 0 : i32
    %c0_i32_0 = arith.constant 0 : i32
    %c0_i32_1 = arith.constant 0 : i32
    return %c0_i32, %c0_i32_0 : i32, i32
  }
  func.func @transform_9(%arg0: i32) -> (i32, i32) {
    %c0_i32 = arith.constant 0 : i32
    %c0_i32_0 = arith.constant 0 : i32
    %c0_i32_1 = arith.constant 0 : i32
    return %c0_i32, %c0_i32_0 : i32, i32
  }
  func.func @transform_10(%arg0: i32) -> (i32, i32) {
    %c0_i32 = arith.constant 0 : i32
    %c0_i32_0 = arith.constant 0 : i32
    %c0_i32_1 = arith.constant 0 : i32
    return %c0_i32, %c0_i32_0 : i32, i32
  }
  func.func @transform_11(%arg0: i32) -> (i32, i32) {
    %c0_i32 = arith.constant 0 : i32
    %c0_i32_0 = arith.constant 0 : i32
    return %arg0, %c0_i32 : i32, i32
  }
}

</mosaic_0001>

<bundles_post_ra>
// kernel: tpu_custom_call.1
= control target key start
LH: loop header
LB: loop body
LE: loop exit
PB: predicated region body
PF: predicated region fallthrough
CT: control target
= control target key end

     0   :  { %16 = vsyncpa [#allocation4], 0  ;;  %s1656_s0 = inlined_call_operand.vmem [shape: f32[2,108], index: 0, kind: input, shape index: {}]   ;;  %s1657_s1 = inlined_call_operand.hbm [shape: bf16[256,512], index: 1, kind: input, shape index: {}]   ;;  %s1658_s2 = inlined_call_operand.vmem [shape: f32[1,512], index: 2, kind: input, shape index: {}]   ;;  %s1659_s3 = inlined_call_operand.vmem [shape: bf16[256,64], index: 3, kind: input, shape index: {}]   ;;  %s1660_s4 = inlined_call_operand.vmem [shape: f32[1,64], index: 4, kind: input, shape index: {}]   ;;  %s1661_s5 = inlined_call_operand.vmem [shape: bf16[64,64], index: 5, kind: input, shape index: {}]   ;;  %s1662_s6 = inlined_call_operand.vmem [shape: f32[1,64], index: 6, kind: input, shape index: {}]   ;;  %s1663_s7 = inlined_call_operand.vmem [shape: bf16[64,64], index: 7, kind: input, shape index: {}]   ;;  %s1664_s8 = inlined_call_operand.vmem [shape: f32[1,64], index: 8, kind: input, shape index: {}]   ;;  %s1665_s9 = inlined_call_operand.vmem [shape: bf16[64,128], index: 9, kind: input, shape index: {}]   ;;  %s1666_s10 = inlined_call_operand.vmem [shape: f32[1,128], index: 10, kind: input, shape index: {}]   ;;  %s1667_s11 = inlined_call_operand.hbm [shape: f32[2,8], index: 11, kind: output, shape index: {}]  }
   0x1   :  { %17 = vsyncpa [#allocation5], 0  ;;  %s1402_s17 = smov [#allocation3]   ;;  %s1354_s21 = scalar_lea.hbm %s1657_s1, 8192 }
   0x2   :  { %s25_s18 = sshll.u32 %s1402_s17, 4  ;;  %p1355_p0 = scmp.ne.s32.totalorder %s1657_s1, %s1354_s21  ;;  %s26_s18 = int_to_ptr.vmem [resolvable:$true] %s25_s18 }
   0x3   :  { %p1358_p1 = scmp.lt.u32.totalorder %s1354_s21, %s1657_s1 }
   0x5   :  { %p1360_p2 = pnand %p1358_p1, %p1355_p0 }
   0x7   :  { %1363 = shalt.err (!%p1360_p2)
}
   0x8   :  { %s1364_s26 = scalar_lea.vmem %s26_s18, 8192  ;;  %p1369_p4 = scmp.lt.s32.totalorder %s26_s18, %s26_s18 }
   0x9   :  { %p1365_p3 = scmp.ne.s32.totalorder %s26_s18, %s1364_s26  ;;  %p1370_p5 = scmp.lt.s32.totalorder %s1364_s26, %s1364_s26 }
   0xb   :  { %p1371_p6 = por %p1370_p5, %p1369_p4 }
   0xd   :  { %p1372_p7 = pnand %p1371_p6, %p1365_p3 }
   0xf   :  { %1375 = shalt.err (!%p1372_p7)
}
  0x10   :  { %s1403_s27 = smov 256   ;;  %s1404_s28 = smov 16  }
  0x11   :  { %31 = dma.hbm_to_vmem [thread:$0]  %s1657_s1, 8192, %s26_s18, [#allocation4], %s1403_s27, %s1403_s27, %s1404_s28  }
  0x12   :  { %1398 = dma.done.wait [#allocation4], 8192  }
  0x13   :  { %1399 = vsyncadd [#allocation4], 4294959104  ;;  %v1222_v0 = vld [vmem:[#allocation3 + $0xc] ss:$16 sps:$4 sm:$0xff]   ;;  %v1224_v1 = vld [vmem:[#allocation3 + $0x8] ss:$16 sps:$4 sm:$0xff]  }
  0x14   :  { %528 = vmatprep.subr.bf16.mxu1 %v1222_v0  ;;  %v1225_v2 = vld [vmem:[#allocation3 + $0x2c] ss:$16 sps:$4 sm:$0xff]   ;;  %v1227_v3 = vld [vmem:[#allocation3 + $0x28] ss:$16 sps:$4 sm:$0xff]   ;;  %v1228_v4 = vld [vmem:[#allocation3 + $0x4] ss:$16 sps:$4 sm:$0xff]  }
  0x15   :  { %529 = vmatpush1.bf16.msra.mxu1 %v1224_v1  ;;  %v1230_v5 = vld [vmem:[#allocation3] ss:$16 sps:$4 sm:$0xff]   ;;  %v1231_v6 = vld [vmem:[#allocation3 + $0x4c] ss:$16 sps:$4 sm:$0xff]   ;;  %485 = vmatprep.subr.bf16.mxu0 %v1228_v4  ;;  %v1234_v7 = vld [vmem:[#allocation3 + $0x24] ss:$16 sps:$4 sm:$0xff]  }
  0x16   :  { %530 = vmatprep.subr.bf16.mxu1 %v1225_v2  ;;  %486 = vmatpush1.bf16.msra.mxu0 %v1230_v5  ;;  %v1236_v8 = vld [vmem:[#allocation3 + $0x20] ss:$16 sps:$4 sm:$0xff]   ;;  %v1233_v9 = vld [vmem:[#allocation3 + $0x48] ss:$16 sps:$4 sm:$0xff]   ;;  %v1237_v10 = vld [vmem:[#allocation3 + $0x6c] ss:$16 sps:$4 sm:$0xff]  }
  0x17   :  { %487 = vmatprep.subr.bf16.mxu0 %v1234_v7  ;;  %v1240_v11 = vld [vmem:[#allocation3 + $0x44] ss:$16 sps:$4 sm:$0xff]   ;;  %v1242_v12 = vld [vmem:[#allocation3 + $0x40] ss:$16 sps:$4 sm:$0xff]   ;;  %v1239_v13 = vld [vmem:[#allocation3 + $0x68] ss:$16 sps:$4 sm:$0xff]  }
  0x18   :  { %v1246_v14 = vld [vmem:[#allocation3 + $0x64] ss:$16 sps:$4 sm:$0xff]   ;;  %v1243_v15 = vld [vmem:[#allocation3 + $0x8c] ss:$16 sps:$4 sm:$0xff]   ;;  %v1248_v16 = vld [vmem:[#allocation3 + $0x60] ss:$16 sps:$4 sm:$0xff]  }
  0x19   :  { %531 = vmatpush1.bf16.msra.mxu1 %v1227_v3  ;;  %v1245_v17 = vld [vmem:[#allocation3 + $0x88] ss:$16 sps:$4 sm:$0xff]   ;;  %v1252_v18 = vld [vmem:[#allocation3 + $0x84] ss:$16 sps:$4 sm:$0xff]   ;;  %v1249_v19 = vld [vmem:[#allocation3 + $0xac] ss:$16 sps:$4 sm:$0xff]  }
  0x1a   :  { %532 = vmatprep.subr.bf16.mxu1 %v1231_v6  ;;  %488 = vmatpush1.bf16.msra.mxu0 %v1236_v8  ;;  %v1254_v20 = vld [vmem:[#allocation3 + $0x80] ss:$16 sps:$4 sm:$0xff]   ;;  %v1251_v21 = vld [vmem:[#allocation3 + $0xa8] ss:$16 sps:$4 sm:$0xff]   ;;  %v1258_v22 = vld [vmem:[#allocation3 + $0xa4] ss:$16 sps:$4 sm:$0xff]  }
  0x1b   :  { %489 = vmatprep.subr.bf16.mxu0 %v1240_v11  ;;  %v1255_v23 = vld [vmem:[#allocation3 + $0xcc] ss:$16 sps:$4 sm:$0xff]   ;;  %v1260_v24 = vld [vmem:[#allocation3 + $0xa0] ss:$16 sps:$4 sm:$0xff]   ;;  %v1257_v25 = vld [vmem:[#allocation3 + $0xc8] ss:$16 sps:$4 sm:$0xff]  }
  0x1c   :  { %v1264_v26 = vld [vmem:[#allocation3 + $0xc4] ss:$16 sps:$4 sm:$0xff]   ;;  %v1261_v27 = vld [vmem:[#allocation3 + $0xec] ss:$16 sps:$4 sm:$0xff]   ;;  %v1266_v28 = vld [vmem:[#allocation3 + $0xc0] ss:$16 sps:$4 sm:$0xff]  }
  0x1d   :  { %533 = vmatpush1.bf16.msra.mxu1 %v1233_v9  ;;  %v1263_v29 = vld [vmem:[#allocation3 + $0xe8] ss:$16 sps:$4 sm:$0xff]   ;;  %v1270_v30 = vld [vmem:[#allocation3 + $0xe4] ss:$16 sps:$4 sm:$0xff]   ;;  %v1267_v31 = vld [vmem:[#allocation3 + $0x10c] ss:$16 sps:$4 sm:$0xff]  }
  0x1e   :  { %534 = vmatprep.subr.bf16.mxu1 %v1237_v10  ;;  %490 = vmatpush1.bf16.msra.mxu0 %v1242_v12  ;;  %v1272_v32 = vld [vmem:[#allocation3 + $0xe0] ss:$16 sps:$4 sm:$0xff]   ;;  %v1269_v33 = vld [vmem:[#allocation3 + $0x108] ss:$16 sps:$4 sm:$0xff]   ;;  %v1276_v34 = vld [vmem:[#allocation3 + $0x104] ss:$16 sps:$4 sm:$0xff]  }
  0x1f   :  { %491 = vmatprep.subr.bf16.mxu0 %v1246_v14  ;;  %v1273_v35 = vld [vmem:[#allocation3 + $0x12c] ss:$16 sps:$4 sm:$0xff]   ;;  %v1278_v36 = vld [vmem:[#allocation3 + $0x100] ss:$16 sps:$4 sm:$0xff]   ;;  %v1275_v37 = vld [vmem:[#allocation3 + $0x128] ss:$16 sps:$4 sm:$0xff]  }
  0x20   :  { %v1282_v38 = vld [vmem:[#allocation3 + $0x124] ss:$16 sps:$4 sm:$0xff]   ;;  %v1279_v39 = vld [vmem:[#allocation3 + $0x14c] ss:$16 sps:$4 sm:$0xff]   ;;  %v1284_v40 = vld [vmem:[#allocation3 + $0x120] ss:$16 sps:$4 sm:$0xff]  }
  0x21   :  { %535 = vmatpush1.bf16.msra.mxu1 %v1239_v13  ;;  %v1281_v41 = vld [vmem:[#allocation3 + $0x148] ss:$16 sps:$4 sm:$0xff]   ;;  %v1288_v42 = vld [vmem:[#allocation3 + $0x144] ss:$16 sps:$4 sm:$0xff]   ;;  %vm63_vm0 = vcmask 883712   ;;  %vm68_vm1 = vcmask 1048416  }
  0x22   :  { %536 = vmatprep.subr.bf16.mxu1 %v1243_v15  ;;  %492 = vmatpush1.bf16.msra.mxu0 %v1248_v16  ;;  %v1285_v43 = vld [vmem:[#allocation3 + $0x16c] ss:$16 sps:$4 sm:$0xff]   ;;  %v1287_v44 = vld [vmem:[#allocation3 + $0x168] ss:$16 sps:$4 sm:$0xff]   ;;  %v1290_v45 = vld [vmem:[#allocation3 + $0x140] ss:$16 sps:$4 sm:$0xff]  }
  0x23   :  { %493 = vmatprep.subr.bf16.mxu0 %v1252_v18  ;;  %v1485_v46 = vld [vmem:[%s1656_s0] sm:$0xff]  ;;  %v1490_v47 = vld [vmem:[%s1656_s0 + $0x8] sm:$0xff]  ;;  %v1405_v52 = vmov 0.0   ;;  %vm1406_vm2 = vmmov 0   ;;  %vm803_vm3 = vcmask 523264   ;;  %vm1022_vm4 = vcmask 64512  }
  0x24   :  { %v57_v48 = vmul.f32 0.2, %v1485_v46  ;;  %v58_v49 = vmul.f32 0.2, %v1490_v47  ;;  %64 = vst.msk [vmem:[#allocation2] sm:$0xff] %vm63_vm0, %v1485_v46  ;;  %65 = vst.msk [vmem:[#allocation2 + $0x10] sm:$0xff] %vm63_vm0, %v1490_v47 }
  0x25   :  { %537 = vmatpush1.bf16.msra.mxu1 %v1245_v17  ;;  %v1291_v50 = vld [vmem:[#allocation3 + $0x18c] ss:$16 sps:$4 sm:$0xff]   ;;  %v1294_v51 = vld [vmem:[#allocation3 + $0x164] ss:$16 sps:$4 sm:$0xff]   ;;  %69 = vst.msk [vmem:[#allocation2] sm:$0xff] %vm68_vm1, %v1405_v52  ;;  %70 = vst.msk [vmem:[#allocation2 + $0x10] sm:$0xff] %vm68_vm1, %v1405_v52 }
  0x26   :  { %538 = vmatprep.subr.bf16.mxu1 %v1249_v19  ;;  %494 = vmatpush1.bf16.msra.mxu0 %v1254_v20  ;;  %v1296_v53 = vld [vmem:[#allocation3 + $0x160] ss:$16 sps:$4 sm:$0xff]   ;;  %v59_v54 = vsub.f32 1.0, %v57_v48  ;;  %v60_v55 = vsub.f32 1.0, %v58_v49  ;;  %v1293_v56 = vld [vmem:[#allocation3 + $0x188] ss:$16 sps:$4 sm:$0xff]  }
  0x27   :  { %495 = vmatprep.subr.bf16.mxu0 %v1258_v22  ;;  %v1300_v57 = vld [vmem:[#allocation3 + $0x184] ss:$16 sps:$4 sm:$0xff]   ;;  %v1297_v60 = vld [vmem:[#allocation3 + $0x1ac] ss:$16 sps:$4 sm:$0xff]   ;;  %v1299_v61 = vld [vmem:[#allocation3 + $0x1a8] ss:$16 sps:$4 sm:$0xff]  }
  0x28   :  { %v61_v58 = vmax.f32 %v59_v54, 0.0  ;;  %v62_v59 = vmax.f32 %v60_v55, 0.0  ;;  %v1302_v62 = vld [vmem:[#allocation3 + $0x180] ss:$16 sps:$4 sm:$0xff]   ;;  %v1303_v63 = vld [vmem:[#allocation3 + $0x1cc] ss:$16 sps:$4 sm:$0xff]  }
  0x29   :  { %539 = vmatpush1.bf16.msra.mxu1 %v1251_v21  ;;  %v1306_v0 = vld [vmem:[#allocation3 + $0x1a4] ss:$16 sps:$4 sm:$0xff]   ;;  %v1308_v1 = vld [vmem:[#allocation3 + $0x1a0] ss:$16 sps:$4 sm:$0xff]   ;;  %v1305_v2 = vld [vmem:[#allocation3 + $0x1c8] ss:$16 sps:$4 sm:$0xff]  }
  0x2a   :  { %540 = vmatprep.subr.bf16.mxu1 %v1255_v23  ;;  %496 = vmatpush1.bf16.msra.mxu0 %v1260_v24  ;;  %66 = vst.msk [vmem:[#allocation2 + $0x8] sm:$0xff] %vm63_vm0, %v61_v58  ;;  %67 = vst.msk [vmem:[#allocation2 + $0x18] sm:$0xff] %vm63_vm0, %v62_v59  ;;  %v1312_v3 = vld [vmem:[#allocation3 + $0x1c4] ss:$16 sps:$4 sm:$0xff]   ;;  %v1309_v4 = vld [vmem:[#allocation3 + $0x1ec] ss:$16 sps:$4 sm:$0xff]  }
  0x2b   :  { %497 = vmatprep.subr.bf16.mxu0 %v1264_v26  ;;  %71 = vst.msk [vmem:[#allocation2 + $0x8] sm:$0xff] %vm68_vm1, %v1405_v52  ;;  %72 = vst.msk [vmem:[#allocation2 + $0x18] sm:$0xff] %vm68_vm1, %v1405_v52  ;;  %v1314_v5 = vld [vmem:[#allocation3 + $0x1c0] ss:$16 sps:$4 sm:$0xff]   ;;  %v1311_v8 = vld [vmem:[#allocation3 + $0x1e8] ss:$16 sps:$4 sm:$0xff]  }
  0x2c   :  { %v73_v10 = vld [vmem:[#allocation2] sm:$0xff]  ;;  %v75_v11 = vld [vmem:[#allocation2 + $0x10] sm:$0xff]  ;;  %v1320_v17 = vld [vmem:[%s1659_s3 + $0x48] sm:$0xff]  }
  0x2d   :  { %541 = vmatpush1.bf16.msra.mxu1 %v1257_v25  ;;  %v1315_v12 = vld [vmem:[#allocation3 + $0x1e4] ss:$16 sps:$4 sm:$0xff]   ;;  %v1317_v13 = vld [vmem:[#allocation3 + $0x1e0] ss:$16 sps:$4 sm:$0xff]   ;;  %v77_v15 = vpack.c.bf16 %v75_v11, %v73_v10  ;;  %v1321_v18 = vld [vmem:[%s1659_s3 + $0x8] sm:$0xff]  }
  0x2e   :  { %542 = vmatprep.subr.bf16.mxu1 %v1261_v27  ;;  %498 = vmatpush1.bf16.msra.mxu0 %v1266_v28  ;;  %v1318_v14 = vld [vmem:[%s1659_s3 + $0x40] sm:$0xff]   ;;  %v1322_v19 = vld [vmem:[%s1659_s3 + $0x50] sm:$0xff]   ;;  %v1324_v21 = vld [vmem:[%s1659_s3 + $0x58] sm:$0xff]  }
  0x2f   :  { %499 = vmatprep.subr.bf16.mxu0 %v1270_v30  ;;  %v1319_v16 = vld [vmem:[%s1659_s3] sm:$0xff]   ;;  %v1323_v20 = vld [vmem:[%s1659_s3 + $0x10] sm:$0xff]   ;;  %v1325_v22 = vld [vmem:[%s1659_s3 + $0x18] sm:$0xff]  }
  0x30   :  { %v1326_v23 = vld [vmem:[%s1659_s3 + $0x60] sm:$0xff]   ;;  %v1328_v25 = vld [vmem:[%s1659_s3 + $0x68] sm:$0xff]   ;;  %v1330_v27 = vld [vmem:[%s1659_s3 + $0x70] sm:$0xff]  }
  0x31   :  { %543 = vmatpush1.bf16.msra.mxu1 %v1263_v29  ;;  %v1327_v24 = vld [vmem:[%s1659_s3 + $0x20] sm:$0xff]   ;;  %v1329_v26 = vld [vmem:[%s1659_s3 + $0x28] sm:$0xff]   ;;  %v1331_v28 = vld [vmem:[%s1659_s3 + $0x30] sm:$0xff]  }
  0x32   :  { %544 = vmatprep.subr.bf16.mxu1 %v1267_v31  ;;  %500 = vmatpush1.bf16.msra.mxu0 %v1272_v32  ;;  %v74_v6 = vld [vmem:[#allocation2 + $0x8] sm:$0xff]  ;;  %v76_v7 = vld [vmem:[#allocation2 + $0x18] sm:$0xff]  ;;  %v1334_v31 = vld [vmem:[%s1661_s5] sm:$0xff]   ;;  %v145_v32 = vlaneseq }
  0x33   :  { %501 = vmatprep.subr.bf16.mxu0 %v1276_v34  ;;  %v78_v9 = vpack.c.bf16 %v76_v7, %v74_v6  ;;  %v1332_v29 = vld [vmem:[%s1659_s3 + $0x78] sm:$0xff]  }
  0x34   :  { %v1333_v30 = vld [vmem:[%s1659_s3 + $0x38] sm:$0xff]  }
  0x35   :  { %545 = vmatpush1.bf16.msra.mxu1 %v1269_v33  ;;  %560 = vmatprep.mubr.bf16.mxu1 %v78_v9  ;;  %v146_v33 = vshrl.u32 %v145_v32, 7  ;;  %v1343_v32 = vld [vmem:[%s1665_s9 + $0x8] sm:$0xff]  }
  0x36   :  { %546 = vmatprep.subr.bf16.mxu1 %v1273_v35  ;;  %502 = vmatpush1.bf16.msra.mxu0 %v1278_v36  ;;  %v143_v35 = vld [vmem:[%s1658_s2] sm:$0xf] }
  0x37   :  { %503 = vmatprep.subr.bf16.mxu0 %v1282_v38  ;;  %517 = vmatprep.mubr.bf16.mxu0 %v78_v9  ;;  %v155_v34 = vsub.s32 2, %v146_v33  ;;  %v159_v36 = vsub.s32 3, %v146_v33 }
  0x39   :  { %547 = vmatpush1.bf16.msra.mxu1 %v1275_v37  ;;  %v156_v37 = vrot.slane %v143_v35, %v155_v34  ;;  %v160_v38 = vrot.slane %v143_v35, %v159_v36 }
  0x3a   :  { %548 = vmatprep.subr.bf16.mxu1 %v1279_v39  ;;  %504 = vmatpush1.bf16.msra.mxu0 %v1284_v40  ;;  %v151_v39 = vsub.s32 1, %v146_v33 }
  0x3b   :  { %505 = vmatprep.subr.bf16.mxu0 %v1288_v42 }
  0x3d   :  { %549 = vmatpush1.bf16.msra.mxu1 %v1281_v41  ;;  %v147_v41 = vsub.s32 0, %v146_v33  ;;  %v1123_v33 = vld [vmem:[%s1662_s6] ss:$0 sm:$0xff] }
  0x3e   :  { %550 = vmatprep.subr.bf16.mxu1 %v1285_v43  ;;  %506 = vmatpush1.bf16.msra.mxu0 %v1290_v45 }
  0x3f   :  { %507 = vmatprep.subr.bf16.mxu0 %v1294_v51  ;;  %v152_v51 = vrot.slane %v143_v35, %v151_v39  ;;  %v148_v54 = vrot.slane %v143_v35, %v147_v41 }
  0x41   :  { %551 = vmatpush1.bf16.msra.mxu1 %v1287_v44 }
  0x42   :  { %552 = vmatprep.subr.bf16.mxu1 %v1291_v50  ;;  %508 = vmatpush1.bf16.msra.mxu0 %v1296_v53 }
  0x43   :  { %509 = vmatprep.subr.bf16.mxu0 %v1300_v57 }
  0x45   :  { %553 = vmatpush1.bf16.msra.mxu1 %v1293_v56 }
  0x46   :  { %554 = vmatprep.subr.bf16.mxu1 %v1297_v60  ;;  %510 = vmatpush1.bf16.msra.mxu0 %v1302_v62 }
  0x47   :  { %511 = vmatprep.subr.bf16.mxu0 %v1306_v0 }
  0x49   :  { %555 = vmatpush1.bf16.msra.mxu1 %v1299_v61 }
  0x4a   :  { %556 = vmatprep.subr.bf16.mxu1 %v1303_v63  ;;  %512 = vmatpush1.bf16.msra.mxu0 %v1308_v1 }
  0x4b   :  { %513 = vmatprep.subr.bf16.mxu0 %v1312_v3 }
  0x4d   :  { %557 = vmatpush1.bf16.msra.mxu1 %v1305_v2 }
  0x4e   :  { %558 = vmatprep.subr.bf16.mxu1 %v1309_v4  ;;  %514 = vmatpush1.bf16.msra.mxu0 %v1314_v5 }
  0x4f   :  { %515 = vmatprep.subr.bf16.mxu0 %v1315_v12  ;;  %v1335_v12 = vld [vmem:[%s1661_s5 + $0x8] sm:$0xff]  }
  0x51   :  { %559 = vmatpush1.bf16.msra.mxu1 %v1311_v8 }
  0x52   :  { %1178 = vmatprep.subr.bf16.mxu1 %v1405_v52  ;;  %516 = vmatpush1.bf16.msra.mxu0 %v1317_v13  ;;  %v1336_v13 = vld [vmem:[%s1661_s5 + $0x10] sm:$0xff]  }
  0x53   :  { %1141 = vmatprep.subr.bf16.mxu0 %v1318_v14  ;;  %v1337_v14 = vld [vmem:[%s1661_s5 + $0x18] sm:$0xff]  }
  0x54   :  { %561 = vmatmul.mubr.bf16.vlgmr.msra.gmra.mrb[0].mxu1 %v77_v15 }
  0x55   :  { %518 = vmatmul.mubr.bf16.vlgmr.msra.gmra.mrb[0].mxu0 %v77_v15  ;;  %1179 = vmatpush3.bf16.msra.mxu1 %v1334_v31  ;;  %v1342_v31 = vld [vmem:[%s1665_s9] sm:$0xff]  }
  0x56   :  { %1142 = vmatpush3.bf16.msra.mxu0 %v1319_v16  ;;  %1180 = vmatprep.subr.bf16.mxu1 %v1405_v52  ;;  %v1106_v16 = vld [vmem:[%s1660_s4] ss:$0 sm:$0xff] }
  0x57   :  { %1143 = vmatprep.subr.bf16.mxu0 %v1320_v17  ;;  %1186 = vmatprep.mubr.msk.bf16.mxu1 %vm1406_vm2, %v1405_v52 }
  0x59   :  { %1181 = vmatpush3.bf16.msra.mxu1 %v1335_v12 }
  0x5a   :  { %1144 = vmatpush3.bf16.msra.mxu0 %v1321_v18  ;;  %1182 = vmatprep.subr.bf16.mxu1 %v1405_v52 }
  0x5b   :  { %1145 = vmatprep.subr.bf16.mxu0 %v1322_v19 }
  0x5d   :  { %1183 = vmatpush3.bf16.msra.mxu1 %v1336_v13 }
  0x5e   :  { %1146 = vmatpush3.bf16.msra.mxu0 %v1323_v20  ;;  %1184 = vmatprep.subr.bf16.mxu1 %v1405_v52 }
  0x5f   :  { %1147 = vmatprep.subr.bf16.mxu0 %v1324_v21 }
  0x61   :  { %1185 = vmatpush3.bf16.msra.mxu1 %v1337_v14 }
  0x62   :  { %1148 = vmatpush3.bf16.msra.mxu0 %v1325_v22  ;;  %1190 = vmatprep.subr.bf16.mxu1 %v1405_v52 }
  0x63   :  { %1149 = vmatprep.subr.bf16.mxu0 %v1326_v23 }
  0x66   :  { %1150 = vmatpush3.bf16.msra.mxu0 %v1327_v24 }
  0x67   :  { %1151 = vmatprep.subr.bf16.mxu0 %v1328_v25 }
  0x6a   :  { %1152 = vmatpush3.bf16.msra.mxu0 %v1329_v26  ;;  %v1338_v26 = vld [vmem:[%s1663_s7] sm:$0xff]  }
  0x6b   :  { %1153 = vmatprep.subr.bf16.mxu0 %v1330_v27 }
  0x6e   :  { %1154 = vmatpush3.bf16.msra.mxu0 %v1331_v28  ;;  %v1339_v28 = vld [vmem:[%s1663_s7 + $0x8] sm:$0xff]  }
  0x6f   :  { %1155 = vmatprep.subr.bf16.mxu0 %v1332_v29  ;;  %v1340_v29 = vld [vmem:[%s1663_s7 + $0x10] sm:$0xff]  }
  0x72   :  { %1156 = vmatpush3.bf16.msra.mxu0 %v1333_v30  ;;  %v1341_v30 = vld [vmem:[%s1663_s7 + $0x18] sm:$0xff]  }
  0x73   :  { %1202 = vmatprep.subr.bf16.mxu0 %v1405_v52 }
 0x127   :  { %v562_v40 = vpop.f32.mrb[0].mxu1 }
 0x128   :  { %v563_v42 = vadd.f32 %v562_v40, %v156_v37  ;;  %v564_v43 = vpop.f32.mrb[1].mxu1  ;;  %v519_v50 = vpop.f32.mrb[0].mxu0 }
 0x129   :  { %v565_v44 = vadd.f32 %v564_v43, %v160_v38  ;;  %v566_v45 = vpop.f32.mrb[2].mxu1  ;;  %v521_v55 = vpop.f32.mrb[1].mxu0  ;;  %v1565_v59 = vadd.f32 %v519_v50, %v148_v54  ;;  %v1344_v43 = vld [vmem:[%s1665_s9 + $0x10] sm:$0xff]  }
 0x12a   :  { %1346 = vtanh.f32 %v563_v42  ;;  %v567_v48 = vadd.f32 %v566_v45, %v156_v37  ;;  %v568_v49 = vpop.f32.mrb[3].mxu1  ;;  %v523_v56 = vpop.f32.mrb[2].mxu0  ;;  %v522_v58 = vadd.f32 %v521_v55, %v152_v51  ;;  %v1129_v45 = vld [vmem:[%s1664_s8] ss:$0 sm:$0xff] }
 0x12b   :  { %1348 = vtanh.f32 %v565_v44  ;;  %v569_v53 = vadd.f32 %v568_v49, %v160_v38  ;;  %v525_v57 = vpop.f32.mrb[3].mxu0  ;;  %v1567_v60 = vadd.f32 %v523_v56, %v148_v54  ;;  %v571_v63 = vmax.f32 %v1565_v59, 0.0  ;;  %v1345_v44 = vld [vmem:[%s1665_s9 + $0x18] sm:$0xff]  }
 0x12c   :  { %1350 = vtanh.f32 %v567_v48  ;;  %v572_v61 = vmax.f32 %v522_v58, 0.0  ;;  %v526_v62 = vadd.f32 %v525_v57, %v152_v51 }
 0x12d   :  { %1352 = vtanh.f32 %v569_v53  ;;  %v573_v2 = vmax.f32 %v1567_v60, 0.0 }
 0x12e   :  { %v574_v5 = vmax.f32 %v526_v62, 0.0 }
 0x134   :  { %v1347_v0 = vpop.eup %1346 }
 0x135   :  { %v1349_v1 = vpop.eup %1348  ;;  %v579_v7 = vmul.f32 %v1347_v0, %v571_v63 }
 0x136   :  { %v1351_v3 = vpop.eup %1350  ;;  %v580_v4 = vmul.f32 %v1349_v1, %v572_v61 }
 0x137   :  { %v1353_v6 = vpop.eup %1352  ;;  %v581_v8 = vmul.f32 %v1351_v3, %v573_v2 }
 0x138   :  { %v582_v9 = vmul.f32 %v1353_v6, %v574_v5 }
 0x139   :  { %v583_v10 = vpack.c.bf16 %v581_v8, %v579_v7 }
 0x13a   :  { %v584_v11 = vpack.c.bf16 %v582_v9, %v580_v4 }
 0x13c   :  { %752 = vmatprep.mubr.bf16.mxu0 %v584_v11 }
 0x13d   :  { %753 = vmatmul.mubr.bf16.vlgmr.msra.gmra.mrb[4].mxu0 %v583_v10 }
 0x13e   :  { %1210 = vmatprep.mubr.msk.bf16.mxu0 %vm1406_vm2, %v1405_v52  ;;  %1203 = vmatpush3.bf16.msra.mxu0 %v1342_v31 }
 0x13f   :  { %1204 = vmatprep.subr.bf16.mxu0 %v1405_v52 }
 0x142   :  { %1205 = vmatpush3.bf16.msra.mxu0 %v1343_v32 }
 0x143   :  { %1206 = vmatprep.subr.bf16.mxu0 %v1405_v52 }
 0x146   :  { %1207 = vmatpush3.bf16.msra.mxu0 %v1344_v43 }
 0x147   :  { %1208 = vmatprep.subr.bf16.mxu0 %v1405_v52 }
 0x14a   :  { %1209 = vmatpush3.bf16.msra.mxu0 %v1345_v44 }
 0x210   :  { %v1157_v15 = vpop.f32.mrb[4].mxu0 }
 0x211   :  { %v1158_v17 = vpop.f32.mrb[5].mxu0 }
 0x212   :  { %v1159_v18 = vadd.f32 %v1158_v17, %v1157_v15  ;;  %v1160_v19 = vpop.f32.mrb[6].mxu0 }
 0x213   :  { %v1161_v20 = vpop.f32.mrb[7].mxu0 }
 0x214   :  { %v755_v21 = vadd.f32 %v1159_v18, %v1106_v16  ;;  %v1162_v22 = vadd.f32 %v1161_v20, %v1160_v19 }
 0x216   :  { %v758_v23 = vadd.f32 %v1162_v22, %v1106_v16  ;;  %v761_v24 = vmax.f32 %v755_v21, 0.0 }
 0x218   :  { %v762_v25 = vmax.f32 %v758_v23, 0.0 }
 0x21a   :  { %v763_v27 = vpack.c.bf16 %v762_v25, %v761_v24 }
 0x21c   :  { %1187 = vmatmul.mubr.msk.bf16.vlgmr.msra.gmra.mrb[4].mxu1 %vm803_vm3, %v763_v27 }
 0x21d   :  { %1191 = vmatpush3.bf16.msra.mxu1 %v1338_v26  ;;  %1198 = vmatprep.mubr.msk.bf16.mxu1 %vm1406_vm2, %v1405_v52 }
 0x21e   :  { %1192 = vmatprep.subr.bf16.mxu1 %v1405_v52 }
 0x221   :  { %1193 = vmatpush3.bf16.msra.mxu1 %v1339_v28 }
 0x222   :  { %1194 = vmatprep.subr.bf16.mxu1 %v1405_v52 }
 0x225   :  { %1195 = vmatpush3.bf16.msra.mxu1 %v1340_v29 }
 0x226   :  { %1196 = vmatprep.subr.bf16.mxu1 %v1405_v52  ;;  %v1135_v52 = vld [vmem:[%s1666_s10] ss:$0 sm:$0xff] }
 0x229   :  { %1197 = vmatpush3.bf16.msra.mxu1 %v1341_v30 }
 0x2ef   :  { %v841_v34 = vpop.f32.mrb[4].mxu1 }
 0x2f0   :  { %v842_v35 = vadd.f32 %v1123_v33, %v841_v34  ;;  %v1188_v36 = vpop.f32.mrb[5].mxu1 }
 0x2f1   :  { %v844_v37 = vpop.f32.mrb[6].mxu1 }
 0x2f2   :  { %v845_v38 = vadd.f32 %v1123_v33, %v844_v37  ;;  %v1189_v39 = vpop.f32.mrb[7].mxu1  ;;  %v848_v40 = vadd.f32 %v842_v35, %v571_v63 }
 0x2f4   :  { %v849_v41 = vadd.f32 %v845_v38, %v573_v2 }
 0x2f6   :  { %v850_v42 = vpack.c.bf16 %v849_v41, %v848_v40 }
 0x2f8   :  { %1199 = vmatmul.mubr.msk.bf16.vlgmr.msra.gmra.mrb[8].mxu1 %vm803_vm3, %v850_v42 }
 0x3cb   :  { %v927_v48 = vpop.f32.mrb[8].mxu1 }
 0x3cc   :  { %v928_v49 = vadd.f32 %v1129_v45, %v927_v48  ;;  %v1200_v50 = vpop.f32.mrb[9].mxu1 }
 0x3cd   :  { %v930_v51 = vpop.f32.mrb[10].mxu1 }
 0x3ce   :  { %v931_v53 = vadd.f32 %v1129_v45, %v930_v51  ;;  %v1201_v54 = vpop.f32.mrb[11].mxu1  ;;  %v934_v55 = vmax.f32 %v928_v49, 0.0 }
 0x3d0   :  { %v935_v56 = vmax.f32 %v931_v53, 0.0 }
 0x3d2   :  { %v936_v57 = vpack.c.bf16 %v935_v56, %v934_v55 }
 0x3d4   :  { %1211 = vmatmul.mubr.msk.bf16.vlgmr.msra.gmra.mrb[8].mxu0 %vm803_vm3, %v936_v57 }
 0x4a7   :  { %v1013_v58 = vpop.f32.mrb[8].mxu0 }
 0x4a8   :  { %v1014_v59 = vadd.f32 %v1135_v52, %v1013_v58  ;;  %v1212_v60 = vpop.f32.mrb[9].mxu0 }
 0x4a9   :  { %v1016_v61 = vpop.f32.mrb[10].mxu0 }
 0x4aa   :  { %v1020_v62 = vadd.f32 %v1014_v59, %v1485_v46  ;;  %v1017_v63 = vadd.f32 %v1135_v52, %v1016_v61  ;;  %v1213_v0 = vpop.f32.mrb[11].mxu0 }
 0x4ac   :  { %1023 = vst.msk [vmem:[#allocation6] sm:$0xff] %vm1022_vm4, %v1020_v62  ;;  %v1021_v1 = vadd.f32 %v1017_v63, %v1490_v47 }
 0x4ae   :  { %1024 = vst.msk [vmem:[#allocation6 + $0x8] sm:$0xff] %vm1022_vm4, %v1021_v1 }
 0x4af   :  { %1029 = vsyncadd [#allocation5], 224  ;;  %s1407_s8 = smov [#allocation6]  }
 0x4b0   :  { %s1030_s9 = sshll.u32 %s1407_s8, 4  ;;  %s1031_s9 = int_to_ptr.vmem [resolvable:$true] %s1030_s9 }
 0x4b1   :  { %s1376_s30 = scalar_lea.vmem %s1031_s9, 32  ;;  %s1380_s10 = scalar_lea.vmem %s1031_s9, 256 }
 0x4b2   :  { %p1377_p8 = scmp.ne.s32.totalorder %s1031_s9, %s1376_s30  ;;  %p1381_p9 = scmp.lt.s32.totalorder %s1031_s9, %s1031_s9 }
 0x4b3   :  { %p1382_p10 = scmp.lt.s32.totalorder %s1380_s10, %s1376_s30 }
 0x4b5   :  { %p1383_p11 = por %p1382_p10, %p1381_p9 }
 0x4b7   :  { %p1384_p12 = pnand %p1383_p11, %p1377_p8 }
 0x4b9   :  { %1387 = shalt.err (!%p1384_p12)
}
 0x4ba   :  { %s1388_s13 = scalar_lea.hbm %s1667_s11, 32 }
 0x4bb   :  { %p1389_p13 = scmp.ne.s32.totalorder %s1667_s11, %s1388_s13  ;;  %p1392_p0 = scmp.lt.u32.totalorder %s1388_s13, %s1667_s11 }
 0x4bd   :  { %p1394_p1 = pnand %p1392_p0, %p1389_p13 }
 0x4bf   :  { %1397 = shalt.err (!%p1394_p1)
}
 0x4c0   :  { %s1408_s4 = smov 32   ;;  %s1409_s16 = smov 2  }
 0x4c1   :  { %1036 = dma.vmem_to_hbm [thread:$0]  %s1031_s9, 32, %s1667_s11, [#allocation5], %s1408_s4, %s1408_s4, %s1409_s16  }
 0x4c2   :  { %1400 = dma.done.wait [#allocation5], 256  }
 0x4c3   :  { %1401 = vsyncadd [#allocation5], 4294967040 }
 0x4c4   :  { %1040 = vsyncpa [#allocation4], 1 }
 0x4c5   :  { %1041 = vsyncpa [#allocation5], 1 }

</bundles_post_ra>
